<compile_context>
chip_gen: v6e
topology: v6e:2x2x1
jax: 0.10.0
libtpu: 0.0.40
codegen_flags: <defaults>
</compile_context>

<pallas_src>
import functools
import math

import jax
import jax.numpy as jnp
from jax import lax
from jax.experimental import pallas as pl
from jax.experimental.pallas import tpu as pltpu


_OUT_LANES = 128     # lane-dense output width (>= k+1 packed keys per row)
_ROW_ALIGN = 16      # bf16 sublane packing: keep row tiles 16-aligned
_VAL_RANGE = 1.02    # cosine sims from bf16 matmuls stay within +-1.02


def _round_up(x, m):
    return ((x + m - 1) // m) * m


def _choose_tiles(n):
    """Row tile, column tile and padded row count for the similarity kernel."""
    n16 = _round_up(n, _ROW_ALIGN)
    if n16 <= 512:
        return n16, n16, n16                   # single tile in each direction
    tile_r, tile_c = 256, 512                  # tile_r divides tile_c divides n_pad
    return tile_r, tile_c, _round_up(n16, tile_c)


def _vmem_limit_bytes():
    """Scoped-VMEM request derived from the chip's physical per-core VMEM."""
    cap = 128 << 20
    try:
        info = pltpu.get_tpu_info()
        cap = int(getattr(info, "vmem_capacity_bytes", cap) or cap)
    except Exception:
        pass
    # Leave >=25% of physical VMEM for Mosaic internal scratch / spills and never
    # request more than 48 MiB so the ask also fits v7x's 64 MiB per TensorCore.
    return int(min(48 << 20, max(16 << 20, (cap * 3) // 4)))


def _mlp_norm_kernel(x_ref, w0_ref, wr_ref, b_ref, out_ref, *, nlayers):
    """Fused MLP (Linear + ReLU stack) + L2 row normalization for one row tile.

    Layer 0 contracts over the unpadded feature dim; its output dim is zero-padded
    to d_pad lanes, and padded lanes stay exactly zero through every later layer
    and through the normalization, so the bf16 output feeds the similarity matmul
    directly (as both LHS row tiles and RHS column tiles).
    """
    h = lax.dot_general(x_ref[...].astype(jnp.bfloat16), w0_ref[...],
                        (((1,), (1,)), ((), ())),
                        preferred_element_type=jnp.float32) + b_ref[0]
    if nlayers > 1:
        h = jnp.maximum(h, 0.0)
    for i in range(1, nlayers):                               # static unroll
        h = lax.dot_general(h.astype(jnp.bfloat16), wr_ref[i - 1],
                            (((1,), (1,)), ((), ())),
                            preferred_element_type=jnp.float32) + b_ref[i]
        if i != nlayers - 1:
            h = jnp.maximum(h, 0.0)
    sq = jnp.sum(h * h, axis=1, keepdims=True)
    # F.normalize(p=2, eps=1e-12) via a single EUP rsqrt (no sqrt + divide chain).
    out_ref[...] = (h * lax.rsqrt(jnp.maximum(sq, 1e-24))).astype(out_ref.dtype)


def _knn_topk_kernel(q_ref, xc_ref, out_ref, *,
                     k1, n_valid, tile_c, n_pad, idx_radix, vmax, scale):
    """One (row tile, column tile) step of cosine similarity + running top-(k+1).

    The running state is the revisited output block itself: lanes 0..k hold the
    current best packed (value, index) keys in descending order, -1 elsewhere.
    """
    c = pl.program_id(1)

    @pl.when(c == 0)
    def _():
        out_ref[...] = jnp.full(out_ref.shape, -1, jnp.int32)

    # MXU: bf16 operands, f32 accumulation, contraction on dim 1 of both operands.
    s = lax.dot_general(q_ref[...], xc_ref[...], (((1,), (1,)), ((), ())),
                        preferred_element_type=jnp.float32)    # (tile_r, tile_c)

    # Fused (value, index) sort key: quantized similarity in the high bits,
    # complemented global column in the low bits -> value max, argmax and
    # smallest-index tie-break all come out of a single reduction.
    gcol = c * tile_c + lax.broadcasted_iota(jnp.int32, s.shape, 1)
    qv = ((jnp.clip(s, -_VAL_RANGE, _VAL_RANGE) + _VAL_RANGE) * scale
          ).astype(jnp.int32)
    qv = jnp.minimum(qv, vmax)
    work = qv * idx_radix + ((n_pad - 1) - gcol)
    work = jnp.where(gcol < n_valid, work, -1)                 # padded columns lose

    run = out_ref[...]                                         # running top-(k+1)
    lane = lax.broadcasted_iota(jnp.int32, run.shape, 1)
    new_run = jnp.full(run.shape, -1, jnp.int32)
    for j in range(k1):                                        # static unroll, k1 small
        m = jnp.maximum(jnp.max(work, axis=-1, keepdims=True),
                        jnp.max(run, axis=-1, keepdims=True))  # (tile_r, 1)
        new_run = jnp.where(lane == j, m, new_run)
        if j != k1 - 1:
            # Keys are unique, so exactly one element matches: knock the selected
            # key out of whichever pool held it (no argmax / full re-mask pass).
            work = jnp.where(work == m, -1, work)
            run = jnp.where(run == m, -1, run)
    out_ref[...] = new_run


def mlp_learner_forward(features, weights, biases, k):
    """Pallas implementation of MLP_learner.forward.

    features: (N, isize) f32
    weights:  (nlayers, isize, isize) f32   (identity-initialized, like param_init)
    biases:   (nlayers, isize) f32
    Returns (edge_index [2, 2*N*(k+1)] i32, edge_weight [2*N*(k+1)] f32).
    """
    N, isize = features.shape
    nlayers = int(weights.shape[0])
    k1 = k + 1
    assert 1 <= k1 <= _OUT_LANES, "k+1 must fit in one 128-lane output slab"
    assert k1 <= N, "knn_fast/topk needs at least k+1 nodes"

    d_pad = max(_round_up(isize, 128), 128)
    tile_r, tile_c, n_pad = _choose_tiles(N)
    grid_r = n_pad // tile_r
    grid_c = n_pad // tile_c

    # Packed-key bit budget: low bits hold the complemented neighbour index,
    # high bits the quantized similarity.
    idx_bits = max(int(math.ceil(math.log2(n_pad))), 1)
    assert idx_bits <= 20, "N too large for the 32-bit packed top-k key"
    idx_radix = 1 << idx_bits
    vmax = (1 << (31 - idx_bits)) - 1
    scale = float(vmax) / (2.0 * _VAL_RANGE)

    vmem_limit = _vmem_limit_bytes()
    f32, bf16 = jnp.float32, jnp.bfloat16

    # Row padding only (no lane-padded f32 copy of the features in HBM).
    feats_p = jnp.zeros((n_pad, isize), f32).at[:N].set(features.astype(f32))
    # Layer-0 weight keeps the unpadded contraction dim; remaining layers are
    # zero-padded to (d_pad, d_pad).  All weights pre-cast to bf16 (MXU-native).
    w0_p = jnp.zeros((d_pad, isize), bf16).at[:isize, :].set(weights[0].astype(bf16))
    nrest = max(nlayers - 1, 1)
    w_rest = jnp.zeros((nrest, d_pad, d_pad), bf16)
    if nlayers > 1:
        w_rest = w_rest.at[:, :isize, :isize].set(weights[1:].astype(bf16))
    b_p = jnp.zeros((nlayers, 1, d_pad), f32).at[:, 0, :isize].set(biases.astype(f32))

    # Kernel 1: fused MLP + L2 normalization -> lane-padded bf16 embeddings.
    xn = pl.pallas_call(
        functools.partial(_mlp_norm_kernel, nlayers=nlayers),
        grid=(grid_r,),
        in_specs=[
            pl.BlockSpec((tile_r, isize), lambda i: (i, 0)),
            pl.BlockSpec((d_pad, isize), lambda i: (0, 0)),          # resident
            pl.BlockSpec((nrest, d_pad, d_pad), lambda i: (0, 0, 0)),  # resident
            pl.BlockSpec((nlayers, 1, d_pad), lambda i: (0, 0, 0)),    # resident
        ],
        out_specs=pl.BlockSpec((tile_r, d_pad), lambda i: (i, 0)),
        out_shape=jax.ShapeDtypeStruct((n_pad, d_pad), bf16),
        compiler_params=pltpu.CompilerParams(
            dimension_semantics=("parallel",),
            vmem_limit_bytes=vmem_limit,
        ),
    )(feats_p, w0_p, w_rest, b_p)

    # Kernel 2: (row tile x column tile) cosine similarity + running top-(k+1).
    keys_p = pl.pallas_call(
        functools.partial(_knn_topk_kernel, k1=k1, n_valid=N, tile_c=tile_c,
                          n_pad=n_pad, idx_radix=idx_radix, vmax=vmax, scale=scale),
        grid=(grid_r, grid_c),
        in_specs=[
            pl.BlockSpec((tile_r, d_pad), lambda r, c: (r, 0)),   # query rows (revisited)
            pl.BlockSpec((tile_c, d_pad), lambda r, c: (c, 0)),   # column tile of xn
        ],
        out_specs=pl.BlockSpec((tile_r, _OUT_LANES), lambda r, c: (r, 0)),
        out_shape=jax.ShapeDtypeStruct((n_pad, _OUT_LANES), jnp.int32),
        compiler_params=pltpu.CompilerParams(
            dimension_semantics=("parallel", "arbitrary"),
            vmem_limit_bytes=vmem_limit,
        ),
    )(xn, xn)

    # Decode packed keys (already sorted descending): value high bits, index low.
    keys = keys_p[:N, :k1]
    qv = keys // idx_radix
    inds = (n_pad - 1) - (keys - qv * idx_radix)
    vals = (qv.astype(jnp.float32) + 0.5) / scale - _VAL_RANGE

    # Glue (pure index bookkeeping, same as the torch code after the knn loop).
    rows = jnp.repeat(jnp.arange(N, dtype=jnp.int32), k1)
    cols = inds.reshape(-1).astype(jnp.int32)
    values = vals.reshape(-1)
    edge_index = jnp.stack(
        [jnp.concatenate([rows, cols]), jnp.concatenate([cols, rows])], axis=0)
    edge_weight = jnp.maximum(jnp.concatenate([values, values]), 0.0)
    return edge_index, edge_weight


def _reference_topk_vals(features, weights, biases, k):
    """Pure-JAX f32 reference for the top-(k+1) similarity values."""
    h = features
    nlayers = weights.shape[0]
    for i in range(nlayers):
        h = h @ weights[i].T + biases[i]
        if i != nlayers - 1:
            h = jnp.maximum(h, 0.0)
    hn = h / jnp.maximum(jnp.linalg.norm(h, axis=1, keepdims=True), 1e-12)
    sims = hn @ hn.T
    vals, _ = lax.top_k(sims, k + 1)
    return vals


if __name__ == "__main__":
    N, isize, nlayers, k = 64, 32, 2, 4

    key = jax.random.PRNGKey(0)
    kf, kb = jax.random.split(key)
    features = jax.random.normal(kf, (N, isize), dtype=jnp.float32)

    # param_init(): every layer weight is the identity matrix.
    weights = jnp.stack([jnp.eye(isize, dtype=jnp.float32)] * nlayers, axis=0)
    # nn.Linear bias keeps its default init U(-1/sqrt(isize), 1/sqrt(isize)).
    bound = 1.0 / (isize ** 0.5)
    biases = jax.random.uniform(
        kb, (nlayers, isize), minval=-bound, maxval=bound, dtype=jnp.float32)

    edge_index, edge_weight = mlp_learner_forward(features, weights, biases, k)
    jax.block_until_ready((edge_index, edge_weight))

    k1 = k + 1
    assert edge_index.shape == (2, 2 * N * k1)
    assert edge_weight.shape == (2 * N * k1,)
    assert bool(jnp.all((edge_index >= 0) & (edge_index < N)))

    # Loose sanity check vs a pure-JAX f32 reference (kernel uses bf16 matmuls and
    # a quantized value/index key, so only coarse agreement is expected).
    ref_vals = jnp.maximum(_reference_topk_vals(features, weights, biases, k), 0.0)
    got_vals = edge_weight[:N * k1].reshape(N, k1)
    max_err = float(jnp.max(jnp.abs(got_vals - ref_vals)))
    assert max_err < 0.1, f"top-k values diverged from reference: {max_err}"

    print("KERNEL_OK")
</pallas_src>

<mosaic_0001>
module attributes {stable_mosaic.version = 11 : i64} {
  func.func @_mlp_norm_kernel(%arg0: i32, %arg1: memref<64x32xf32, #tpu.memory_space<vmem>>, %arg2: memref<128x32xbf16, #tpu.memory_space<vmem>>, %arg3: memref<1x128x128xbf16, #tpu.memory_space<vmem>>, %arg4: memref<2x1x128xf32, #tpu.memory_space<vmem>>, %arg5: memref<64x128xbf16, #tpu.memory_space<vmem>>) attributes {dimension_semantics = [#tpu.dimension_semantics<parallel>], iteration_bounds = array<i64: 1>, scalar_prefetch = 0 : i64, scratch_operands = 0 : i64, tpu.core_type = #tpu.core_type<tc>, window_params = [{transform_indices = @transform_0, window_bounds = array<i64: 64, 32>}, {pipeline_mode = #tpu.pipeline_mode<synchronous>, transform_indices = @transform_1, window_bounds = array<i64: 128, 32>}, {pipeline_mode = #tpu.pipeline_mode<synchronous>, transform_indices = @transform_2, window_bounds = array<i64: 1, 128, 128>}, {pipeline_mode = #tpu.pipeline_mode<synchronous>, transform_indices = @transform_3, window_bounds = array<i64: 2, 1, 128>}, {transform_indices = @transform_4, window_bounds = array<i64: 64, 128>}]} {
    %c0 = arith.constant 0 : index
    %c0_0 = arith.constant 0 : index
    %0 = vector.load %arg1[%c0, %c0_0] : memref<64x32xf32, #tpu.memory_space<vmem>>, vector<64x32xf32>
    %1 = arith.truncf %0 : vector<64x32xf32> to vector<64x32xbf16>
    %c0_1 = arith.constant 0 : index
    %c0_2 = arith.constant 0 : index
    %2 = vector.load %arg2[%c0_1, %c0_2] : memref<128x32xbf16, #tpu.memory_space<vmem>>, vector<128x32xbf16>
    %cst = arith.constant dense<0.000000e+00> : vector<64x128xf32>
    %3 = tpu.matmul %1, %2, %cst {dimension_numbers = #tpu.dot_dimension_numbers<[1], [1], [0], [0], [0, 0, 1, 0], [], []>} : vector<64x32xbf16>, vector<128x32xbf16>, vector<64x128xf32> -> vector<64x128xf32>
    %c0_3 = arith.constant 0 : index
    %c0_4 = arith.constant 0 : index
    %c0_5 = arith.constant 0 : index
    %4 = vector.load %arg4[%c0_3, %c0_4, %c0_5] : memref<2x1x128xf32, #tpu.memory_space<vmem>>, vector<1x1x128xf32>
    %5 = vector.shape_cast %4 : vector<1x1x128xf32> to vector<1x128xf32>
    %6 = vector.broadcast %5 : vector<1x128xf32> to vector<64x128xf32>
    %7 = arith.addf %3, %6 : vector<64x128xf32>
    %cst_6 = arith.constant 0.000000e+00 : f32
    %8 = vector.broadcast %cst_6 : f32 to vector<64x128xf32>
    %9 = arith.maximumf %7, %8 : vector<64x128xf32>
    %10 = arith.truncf %9 : vector<64x128xf32> to vector<64x128xbf16>
    %c0_7 = arith.constant 0 : index
    %c0_8 = arith.constant 0 : index
    %c0_9 = arith.constant 0 : index
    %11 = vector.load %arg3[%c0_7, %c0_8, %c0_9] : memref<1x128x128xbf16, #tpu.memory_space<vmem>>, vector<1x128x128xbf16>
    %12 = vector.shape_cast %11 : vector<1x128x128xbf16> to vector<128x128xbf16>
    %cst_10 = arith.constant dense<0.000000e+00> : vector<64x128xf32>
    %13 = tpu.matmul %10, %12, %cst_10 {dimension_numbers = #tpu.dot_dimension_numbers<[1], [1], [0], [0], [0, 0, 1, 0], [], []>} : vector<64x128xbf16>, vector<128x128xbf16>, vector<64x128xf32> -> vector<64x128xf32>
    %c1 = arith.constant 1 : index
    %c0_11 = arith.constant 0 : index
    %c0_12 = arith.constant 0 : index
    %14 = vector.load %arg4[%c1, %c0_11, %c0_12] : memref<2x1x128xf32, #tpu.memory_space<vmem>>, vector<1x1x128xf32>
    %15 = vector.shape_cast %14 : vector<1x1x128xf32> to vector<1x128xf32>
    %16 = vector.broadcast %15 : vector<1x128xf32> to vector<64x128xf32>
    %17 = arith.addf %13, %16 : vector<64x128xf32>
    %18 = arith.mulf %17, %17 : vector<64x128xf32>
    %cst_13 = arith.constant dense<0.000000e+00> : vector<64xf32>
    %19 = vector.multi_reduction <add>, %18, %cst_13 [1] : vector<64x128xf32> to vector<64xf32>
    %20 = vector.shape_cast %19 : vector<64xf32> to vector<64x1xf32>
    %cst_14 = arith.constant 1.000000e-24 : f32
    %21 = vector.broadcast %cst_14 : f32 to vector<64x1xf32>
    %22 = arith.maximumf %20, %21 : vector<64x1xf32>
    %23 = math.rsqrt %22 : vector<64x1xf32>
    %24 = vector.broadcast %23 : vector<64x1xf32> to vector<64x128xf32>
    %25 = arith.mulf %17, %24 : vector<64x128xf32>
    %26 = arith.truncf %25 : vector<64x128xf32> to vector<64x128xbf16>
    %c0_15 = arith.constant 0 : index
    %c0_16 = arith.constant 0 : index
    %27 = vector.load %arg5[%c0_15, %c0_16] : memref<64x128xbf16, #tpu.memory_space<vmem>>, vector<64x128xbf16>
    tpu.vector_store %arg5[%c0_15, %c0_16], %26 {strides = array<i32>} : memref<64x128xbf16, #tpu.memory_space<vmem>>, vector<64x128xbf16>,
    return
  }
  func.func @transform_0(%arg0: i32) -> (i32, i32) {
    %c0_i32 = arith.constant 0 : i32
    %c0_i32_0 = arith.constant 0 : i32
    return %arg0, %c0_i32 : i32, i32
  }
  func.func @transform_1(%arg0: i32) -> (i32, i32) {
    %c0_i32 = arith.constant 0 : i32
    %c0_i32_0 = arith.constant 0 : i32
    %c0_i32_1 = arith.constant 0 : i32
    return %c0_i32, %c0_i32_0 : i32, i32
  }
  func.func @transform_2(%arg0: i32) -> (i32, i32, i32) {
    %c0_i32 = arith.constant 0 : i32
    %c0_i32_0 = arith.constant 0 : i32
    %c0_i32_1 = arith.constant 0 : i32
    %c0_i32_2 = arith.constant 0 : i32
    return %c0_i32, %c0_i32_0, %c0_i32_1 : i32, i32, i32
  }
  func.func @transform_3(%arg0: i32) -> (i32, i32, i32) {
    %c0_i32 = arith.constant 0 : i32
    %c0_i32_0 = arith.constant 0 : i32
    %c0_i32_1 = arith.constant 0 : i32
    %c0_i32_2 = arith.constant 0 : i32
    return %c0_i32, %c0_i32_0, %c0_i32_1 : i32, i32, i32
  }
  func.func @transform_4(%arg0: i32) -> (i32, i32) {
    %c0_i32 = arith.constant 0 : i32
    %c0_i32_0 = arith.constant 0 : i32
    return %arg0, %c0_i32 : i32, i32
  }
}

</mosaic_0001>

<bundles_post_ra>
// kernel: tpu_custom_call.1
= control target key start
LH: loop header
LB: loop body
LE: loop exit
PB: predicated region body
PF: predicated region fallthrough
CT: control target
= control target key end

     0   :  { %vm94_vm0 = vcmask 261120   ;;  %s777_s0 = inlined_call_operand.vmem [shape: f32[64,32], index: 0, kind: input, shape index: {}]   ;;  %s778_s1 = inlined_call_operand.vmem [shape: bf16[128,32], index: 1, kind: input, shape index: {}]   ;;  %s779_s2 = inlined_call_operand.vmem [shape: bf16[1,128,128], index: 2, kind: input, shape index: {}]   ;;  %s780_s3 = inlined_call_operand.vmem [shape: f32[2,1,128], index: 3, kind: input, shape index: {}]   ;;  %s781_s4 = inlined_call_operand.hbm [shape: bf16[64,128], index: 4, kind: output, shape index: {}]  }
   0x1   :  { %v594_v0 = vld [vmem:[%s778_s1 + $0x38] sm:$0xff]   ;;  %v595_v1 = vld [vmem:[%s778_s1 + $0x30] sm:$0xff]   ;;  %v596_v4 = vld [vmem:[%s778_s1 + $0x28] sm:$0xff]  }
   0x2   :  { %583 = vmatprep.subr.msk.bf16.mxu0 %vm94_vm0, %v594_v0  ;;  %v129_v2 = vsel %vm94_vm0, %v594_v0, 0  ;;  %v126_v3 = vsel %vm94_vm0, %v595_v1, 0  ;;  %v19_v5 = vld [vmem:[%s777_s0] sm:$0xff]  ;;  %v20_v6 = vld [vmem:[%s777_s0 + $0x8] sm:$0xff]  ;;  %v602_v8 = vld [vmem:[%s779_s2 + $0x38] sm:$0xff]   ;;  %v123_v10 = vsel %vm94_vm0, %v596_v4, 0 }
   0x3   :  { %536 = vmatpush3.bf16.xpose.msra.mxu0 %v129_v2  ;;  %v27_v7 = vpack.c.bf16 %v20_v6, %v19_v5  ;;  %v603_v9 = vld [vmem:[%s779_s2 + $0x30] sm:$0xff]   ;;  %559 = vmatprep.subr.bf16.mxu1 %v602_v8  ;;  %v597_v11 = vld [vmem:[%s778_s1 + $0x20] sm:$0xff]  }
   0x4   :  { %584 = vmatprep.subr.msk.bf16.mxu0 %vm94_vm0, %v595_v1  ;;  %560 = vmatpush3.bf16.xpose.msra.mxu1 %v602_v8 }
   0x5   :  { %551 = vmatprep.mubr.msk.bf16.mxu0 %vm94_vm0, %v27_v7  ;;  %561 = vmatprep.subr.bf16.mxu1 %v603_v9 }
   0xb   :  { %538 = vmatpush3.bf16.xpose.msra.mxu0 %v126_v3 }
   0xc   :  { %585 = vmatprep.subr.msk.bf16.mxu0 %vm94_vm0, %v596_v4 }
   0xd   :  { %9 = vsyncpa [#allocation3], 0  ;;  %v604_v12 = vld [vmem:[%s779_s2 + $0x28] sm:$0xff]   ;;  %562 = vmatpush3.bf16.xpose.msra.mxu1 %v603_v9  ;;  %v120_v13 = vsel %vm94_vm0, %v597_v11, 0  ;;  %v598_v14 = vld [vmem:[%s778_s1 + $0x18] sm:$0xff]  }
   0xe   :  { %563 = vmatprep.subr.bf16.mxu1 %v604_v12  ;;  %v605_v15 = vld [vmem:[%s779_s2 + $0x20] sm:$0xff]   ;;  %v117_v16 = vsel %vm94_vm0, %v598_v14, 0  ;;  %v599_v17 = vld [vmem:[%s778_s1 + $0x10] sm:$0xff]   ;;  %v606_v18 = vld [vmem:[%s779_s2 + $0x18] sm:$0xff]  }
   0xf   :  { %v114_v19 = vsel %vm94_vm0, %v599_v17, 0  ;;  %v600_v20 = vld [vmem:[%s778_s1 + $0x8] sm:$0xff]   ;;  %v607_v21 = vld [vmem:[%s779_s2 + $0x10] sm:$0xff]   ;;  %v601_v23 = vld [vmem:[%s778_s1] sm:$0xff]  }
  0x10   :  { %v111_v22 = vsel %vm94_vm0, %v600_v20, 0  ;;  %v608_v24 = vld [vmem:[%s779_s2 + $0x8] sm:$0xff]   ;;  %v108_v25 = vsel %vm94_vm0, %v601_v23, 0  ;;  %v21_v26 = vld [vmem:[%s777_s0 + $0x10] sm:$0xff]  ;;  %v22_v27 = vld [vmem:[%s777_s0 + $0x18] sm:$0xff] }
  0x11   :  { %v23_v28 = vld [vmem:[%s777_s0 + $0x20] sm:$0xff]  ;;  %v24_v29 = vld [vmem:[%s777_s0 + $0x28] sm:$0xff]  ;;  %v28_v30 = vpack.c.bf16 %v22_v27, %v21_v26  ;;  %v25_v32 = vld [vmem:[%s777_s0 + $0x30] sm:$0xff] }
  0x12   :  { %v29_v31 = vpack.c.bf16 %v24_v29, %v23_v28  ;;  %v26_v33 = vld [vmem:[%s777_s0 + $0x38] sm:$0xff]  ;;  %v609_v35 = vld [vmem:[%s779_s2] sm:$0xff]  }
  0x13   :  { %540 = vmatpush3.bf16.xpose.msra.mxu0 %v123_v10  ;;  %v30_v34 = vpack.c.bf16 %v26_v33, %v25_v32  ;;  %v449_v38 = vld [vmem:[%s780_s3] ss:$0 sm:$0xff]  ;;  %v463_v1 = vld [vmem:[%s780_s3 + $0x1] ss:$0 sm:$0xff]  ;;  %s648_s3 = smov [#allocation2]  }
  0x14   :  { %586 = vmatprep.subr.msk.bf16.mxu0 %vm94_vm0, %v597_v11  ;;  %s438_s12 = sshll.u32 %s648_s3, 4  ;;  %s439_s12 = int_to_ptr.vmem [resolvable:$true] %s438_s12 }
  0x15   :  { %564 = vmatpush3.bf16.xpose.msra.mxu1 %v604_v12  ;;  %s626_s13 = scalar_lea.vmem %s439_s12, 512  ;;  %p631_p1 = scmp.lt.s32.totalorder %s439_s12, %s439_s12 }
  0x16   :  { %565 = vmatprep.subr.bf16.mxu1 %v605_v15  ;;  %p627_p0 = scmp.ne.s32.totalorder %s439_s12, %s626_s13  ;;  %p632_p2 = scmp.lt.s32.totalorder %s626_s13, %s626_s13 }
  0x18   :  { %p633_p3 = por %p632_p2, %p631_p1 }
  0x1a   :  { %p634_p4 = pnand %p633_p3, %p627_p0 }
  0x1b   :  { %542 = vmatpush3.bf16.xpose.msra.mxu0 %v120_v13 }
  0x1c   :  { %587 = vmatprep.subr.msk.bf16.mxu0 %vm94_vm0, %v598_v14 }
  0x1d   :  { %566 = vmatpush3.bf16.xpose.msra.mxu1 %v605_v15 }
  0x1e   :  { %567 = vmatprep.subr.bf16.mxu1 %v606_v18 }
  0x23   :  { %544 = vmatpush3.bf16.xpose.msra.mxu0 %v117_v16 }
  0x24   :  { %588 = vmatprep.subr.msk.bf16.mxu0 %vm94_vm0, %v599_v17 }
  0x25   :  { %568 = vmatpush3.bf16.xpose.msra.mxu1 %v606_v18 }
  0x26   :  { %569 = vmatprep.subr.bf16.mxu1 %v607_v21 }
  0x2b   :  { %546 = vmatpush3.bf16.xpose.msra.mxu0 %v114_v19 }
  0x2c   :  { %589 = vmatprep.subr.msk.bf16.mxu0 %vm94_vm0, %v600_v20 }
  0x2d   :  { %570 = vmatpush3.bf16.xpose.msra.mxu1 %v607_v21 }
  0x2e   :  { %571 = vmatprep.subr.bf16.mxu1 %v608_v24 }
  0x33   :  { %548 = vmatpush3.bf16.xpose.msra.mxu0 %v111_v22 }
  0x34   :  { %590 = vmatprep.subr.msk.bf16.mxu0 %vm94_vm0, %v601_v23 }
  0x35   :  { %572 = vmatpush3.bf16.xpose.msra.mxu1 %v608_v24 }
  0x36   :  { %573 = vmatprep.subr.bf16.mxu1 %v609_v35 }
  0x3b   :  { %550 = vmatpush3.bf16.xpose.msra.mxu0 %v108_v25 }
  0x3d   :  { %574 = vmatpush3.bf16.xpose.msra.mxu1 %v609_v35 }
  0x42   :  { %552 = vmatmul.mubr.msk.bf16.vlgmr.msra.gmra.mxu0 %vm94_vm0, %v28_v30 }
  0x43   :  { %555 = vmatprep.mubr.msk.bf16.mxu0 %vm94_vm0, %v29_v31 }
  0x4a   :  { %556 = vmatmul.mubr.msk.bf16.gmra.mxu0 %vm94_vm0, %v30_v34 }
 0x102   :  { %v553_v36 = vpop.f32.mrf.mxu0 }
 0x103   :  { %v174_v42 = vadd.f32 %v553_v36, %v449_v38 }
 0x104   :  { %v165_v37 = vpop.f32.mrf.mxu0 }
 0x105   :  { %v166_v40 = vadd.f32 %v449_v38, %v165_v37  ;;  %v198_v49 = vmax.f32 %v174_v42, 0.0 }
 0x106   :  { %v554_v39 = vpop.f32.mrf.mxu0 }
 0x107   :  { %v177_v41 = vadd.f32 %v554_v39, %v449_v38  ;;  %v196_v47 = vmax.f32 %v166_v40, 0.0 }
 0x108   :  { %v168_v43 = vpop.f32.mrf.mxu0 }
 0x109   :  { %v169_v44 = vadd.f32 %v449_v38, %v168_v43  ;;  %v199_v45 = vmax.f32 %v177_v41, 0.0 }
 0x10a   :  { %v557_v46 = vpop.f32.mrf.mxu0 }
 0x10b   :  { %v197_v48 = vmax.f32 %v169_v44, 0.0  ;;  %v205_v52 = vpack.c.bf16 %v199_v45, %v198_v49  ;;  %v190_v56 = vadd.f32 %v557_v46, %v449_v38 }
 0x10c   :  { %v181_v50 = vpop.f32.mrf.mxu0 }
 0x10d   :  { %v204_v51 = vpack.c.bf16 %v197_v48, %v196_v47  ;;  %v182_v54 = vadd.f32 %v449_v38, %v181_v50  ;;  %v202_v62 = vmax.f32 %v190_v56, 0.0 }
 0x10e   :  { %v558_v53 = vpop.f32.mrf.mxu0 }
 0x10f   :  { %v193_v55 = vadd.f32 %v558_v53, %v449_v38  ;;  %575 = vmatprep.mubr.bf16.mxu1 %v204_v51  ;;  %v200_v60 = vmax.f32 %v182_v54, 0.0 }
 0x110   :  { %v184_v57 = vpop.f32.mrf.mxu0  ;;  %576 = vmatmul.mubr.bf16.vlgmr.msra.gmra.mxu1 %v205_v52 }
 0x111   :  { %v185_v58 = vadd.f32 %v449_v38, %v184_v57  ;;  %v203_v59 = vmax.f32 %v193_v55, 0.0 }
 0x113   :  { %v201_v61 = vmax.f32 %v185_v58, 0.0  ;;  %v207_v0 = vpack.c.bf16 %v203_v59, %v202_v62 }
 0x115   :  { %v206_v63 = vpack.c.bf16 %v201_v61, %v200_v60 }
 0x117   :  { %579 = vmatprep.mubr.bf16.mxu1 %v206_v63 }
 0x118   :  { %580 = vmatmul.mubr.bf16.gmra.mxu1 %v207_v0 }
 0x1d0   :  { %v577_v2 = vpop.f32.mrf.mxu1 }
 0x1d1   :  { %v323_v3 = vadd.f32 %v577_v2, %v463_v1 }
 0x1d2   :  { %v314_v4 = vpop.f32.mrf.mxu1 }
 0x1d3   :  { %v315_v5 = vadd.f32 %v463_v1, %v314_v4  ;;  %v347_v6 = vmul.f32 %v323_v3, %v323_v3 }
 0x1d4   :  { %v578_v7 = vpop.f32.mrf.mxu1 }
 0x1d5   :  { %v326_v8 = vadd.f32 %v578_v7, %v463_v1  ;;  %357 = vadd.xlane.f32.xlu1 %v347_v6  ;;  %v345_v9 = vmul.f32 %v315_v5, %v315_v5 }
 0x1d6   :  { %v317_v10 = vpop.f32.mrf.mxu1 }
 0x1d7   :  { %v318_v11 = vadd.f32 %v463_v1, %v317_v10  ;;  %353 = vadd.xlane.f32.xlu0 %v345_v9  ;;  %v348_v12 = vmul.f32 %v326_v8, %v326_v8 }
 0x1d8   :  { %v581_v13 = vpop.f32.mrf.mxu1 }
 0x1d9   :  { %359 = vadd.xlane.f32.xlu1 %v348_v12  ;;  %v346_v14 = vmul.f32 %v318_v11, %v318_v11  ;;  %v339_v18 = vadd.f32 %v581_v13, %v463_v1 }
 0x1da   :  { %v330_v15 = vpop.f32.mrf.mxu1 }
 0x1db   :  { %v331_v16 = vadd.f32 %v463_v1, %v330_v15  ;;  %355 = vadd.xlane.f32.xlu0 %v346_v14  ;;  %v351_v24 = vmul.f32 %v339_v18, %v339_v18 }
 0x1dc   :  { %v582_v17 = vpop.f32.mrf.mxu1 }
 0x1dd   :  { %v349_v19 = vmul.f32 %v331_v16, %v331_v16  ;;  %v342_v22 = vadd.f32 %v582_v17, %v463_v1 }
 0x1de   :  { %v333_v20 = vpop.f32.mrf.mxu1 }
 0x1df   :  { %v334_v21 = vadd.f32 %v463_v1, %v333_v20  ;;  %361 = vadd.xlane.f32.xlu0 %v349_v19  ;;  %v352_v25 = vmul.f32 %v342_v22, %v342_v22 }
 0x1e1   :  { %v350_v23 = vmul.f32 %v334_v21, %v334_v21 }
 0x1e3   :  { %363 = vadd.xlane.f32.xlu1 %v350_v23  ;;  %365 = vadd.xlane.f32.xlu0 %v351_v24 }
 0x1e7   :  { %367 = vadd.xlane.f32.xlu1 %v352_v25 }
 0x25e   :  { %v358_v26 = vpop.xlane.xlu1 %357 }
 0x25f   :  { %v371_v27 = vmax.f32 %v358_v26, 1e-24 }
 0x260   :  { %v354_v28 = vpop.xlane.xlu0 %353 }
 0x261   :  { %v369_v29 = vmax.f32 %v354_v28, 1e-24  ;;  %610 = vrsqrt.f32 %v371_v27 }
 0x262   :  { %v360_v30 = vpop.xlane.xlu1 %359 }
 0x263   :  { %v372_v31 = vmax.f32 %v360_v30, 1e-24  ;;  %612 = vrsqrt.f32 %v369_v29 }
 0x264   :  { %v356_v32 = vpop.xlane.xlu0 %355 }
 0x265   :  { %614 = vrsqrt.f32 %v372_v31  ;;  %v370_v33 = vmax.f32 %v356_v32, 1e-24 }
 0x267   :  { %616 = vrsqrt.f32 %v370_v33 }
 0x268   :  { %v362_v34 = vpop.xlane.xlu0 %361 }
 0x269   :  { %v373_v35 = vmax.f32 %v362_v34, 1e-24 }
 0x26b   :  { %618 = vrsqrt.f32 %v373_v35 }
 0x26c   :  { %v364_v36 = vpop.xlane.xlu1 %363  ;;  %v366_v37 = vpop.xlane.xlu0 %365 }
 0x26d   :  { %v374_v38 = vmax.f32 %v364_v36, 1e-24  ;;  %v375_v39 = vmax.f32 %v366_v37, 1e-24 }
 0x26e   :  { %v611_v40 = vpop.eup %610 }
 0x26f   :  { %620 = vrsqrt.f32 %v374_v38  ;;  %v387_v45 = vmul.f32 %v611_v40, %v323_v3 }
 0x270   :  { %v368_v41 = vpop.xlane.xlu1 %367  ;;  %v613_v42 = vpop.eup %612  ;;  %622 = vrsqrt.f32 %v375_v39 }
 0x271   :  { %v376_v43 = vmax.f32 %v368_v41, 1e-24  ;;  %v385_v48 = vmul.f32 %v613_v42, %v315_v5 }
 0x272   :  { %v615_v44 = vpop.eup %614 }
 0x273   :  { %v388_v46 = vmul.f32 %v615_v44, %v326_v8  ;;  %624 = vrsqrt.f32 %v376_v43 }
 0x274   :  { %v617_v47 = vpop.eup %616 }
 0x275   :  { %v386_v49 = vmul.f32 %v617_v47, %v318_v11  ;;  %v496_v50 = vpack.c.bf16 %v388_v46, %v387_v45 }
 0x277   :  { %v491_v51 = vpack.c.bf16 %v386_v49, %v385_v48  ;;  %508 = vst [vmem:[#allocation2 + $0x8] sm:$0xff] %v496_v50  }
 0x278   :  { %v619_v52 = vpop.eup %618 }
 0x279   :  { %492 = vst [vmem:[#allocation2] sm:$0xff] %v491_v51   ;;  %v389_v54 = vmul.f32 %v619_v52, %v331_v16 }
 0x27c   :  { %v621_v53 = vpop.eup %620 }
 0x27d   :  { %v390_v55 = vmul.f32 %v621_v53, %v334_v21  ;;  %v623_v56 = vpop.eup %622 }
 0x27e   :  { %v391_v59 = vmul.f32 %v623_v56, %v339_v18 }
 0x27f   :  { %v501_v57 = vpack.c.bf16 %v390_v55, %v389_v54 }
 0x280   :  { %v625_v58 = vpop.eup %624 }
 0x281   :  { %v392_v60 = vmul.f32 %v625_v58, %v342_v22  ;;  %509 = vst [vmem:[#allocation2 + $0x10] sm:$0xff] %v501_v57  }
 0x283   :  { %v506_v61 = vpack.c.bf16 %v392_v60, %v391_v59 }
 0x285   :  { %510 = vst [vmem:[#allocation2 + $0x18] sm:$0xff] %v506_v61  }
 0x286   :  { %637 = shalt.err (!%p634_p4)
}
 0x287   :  { %s649_s14 = smov 64   ;;  %s650_s15 = smov 4  }
 0x288   :  { %444 = dma.vmem_to_hbm [thread:$0]  %s439_s12, 512, %s781_s4, [#allocation3], %s649_s14, %s649_s14, %s650_s15  }
 0x289   :  { %646 = dma.done.wait [#allocation3], 512  }
 0x28a   :  { %647 = vsyncadd [#allocation3], 4294966784 }
 0x28b   :  { %448 = vsyncpa [#allocation3], 1 }

</bundles_post_ra>
